<compile_context>
chip_gen: v5e
topology: v5e:2x2
jax: 0.10.0
libtpu: 0.0.40
codegen_flags: <defaults>
</compile_context>

<pallas_src>
import jax
import jax.numpy as jnp
from jax.experimental import pallas as pl
from jax.experimental.pallas import tpu as pltpu

DATA_DIM = 8          # data_dim
FLOW_HIDDEN = 32      # flow_hidden_dim
CLF_HIDDEN = 32       # classifier_hidden_dim

# ---- packed-parameter layout (row offsets into the single param slab) ----
_R_W1F = 2 * FLOW_HIDDEN        # fused flow first layer       (2H, D)
_R_W2F = 4 * DATA_DIM           # fused flow second layer      (4D, 2H)
_R_CW1 = CLF_HIDDEN             # classifier layer 1           (C, D)
_R_CW2 = CLF_HIDDEN             # classifier layer 2           (C, C)
_R_CW3 = 1                      # classifier head              (1, C)

_OFF_W1F = 0
_OFF_W2F = _OFF_W1F + _R_W1F    # 64
_OFF_CW1 = _OFF_W2F + _R_W2F    # 96
_OFF_CW2 = _OFF_CW1 + _R_CW1    # 128
_OFF_CW3 = _OFF_CW2 + _R_CW2    # 160
_SLAB_ROWS = _OFF_CW3 + _R_CW3  # 161

_BIAS_COL = 2 * FLOW_HIDDEN     # 64: bias lives in the last slab column
_SLAB_WIDTH = _BIAS_COL + 1     # 65 (weights in cols [0:64], bias in col 64)


# ---------------------------------------------------------------------------
# Kernel (lane-dense: batch on lanes, computes W^T @ X throughout)
# ---------------------------------------------------------------------------
def _binary_fair_kernel(data_ref, ctx_ref, w_ref, out_ref):
    D, H, C = DATA_DIM, FLOW_HIDDEN, CLF_HIDDEN
    BC = _BIAS_COL

    x = data_ref[...]                                              # (D, TB) f32
    ctx = ctx_ref[...]                                             # (1, TB) f32
    is0 = ctx == 0.0                                               # (1, TB) bool
    valid = jnp.logical_or(is0, ctx == 1.0)                        # (1, TB) bool

    # ---- fused flow0 + flow1 MADE hidden layer: one matmul + one ReLU ----
    w1f = w_ref[_OFF_W1F:_OFF_W1F + _R_W1F, 0:D]                   # (2H, D)
    b1f = w_ref[_OFF_W1F:_OFF_W1F + _R_W1F, BC:BC + 1]             # (2H, 1)
    h = jnp.maximum(
        jnp.dot(w1f, x, preferred_element_type=jnp.float32) + b1f, 0.0
    )                                                              # (2H, TB)

    # ---- fused block-diagonal second layer -> [u0; t0; u1; t1] ----
    w2f = w_ref[_OFF_W2F:_OFF_W2F + _R_W2F, 0:2 * H]               # (4D, 2H)
    b2f = w_ref[_OFF_W2F:_OFF_W2F + _R_W2F, BC:BC + 1]             # (4D, 1)
    s = jnp.dot(w2f, h, preferred_element_type=jnp.float32) + b2f  # (4D, TB)

    u0 = s[0:D]
    t0 = s[D:2 * D]
    u1 = s[2 * D:3 * D]
    t1 = s[3 * D:4 * D]

    # Select BEFORE the affine transform: one sigmoid + one FMA instead of two.
    # nflows MaskedAffineAutoregressiveTransform forward:
    #   scale = sigmoid(u + 2) + 1e-3 ; z = scale * x + shift
    u = jnp.where(is0, u0, u1)                                     # (D, TB)
    t = jnp.where(is0, t0, t1)                                     # (D, TB)
    scale = jax.nn.sigmoid(u + 2.0) + 1e-3
    # Final validity select keeps exact parity with z0*(c==0)+z1*(c==1):
    # any context not in {0,1} yields an all-zero embedding.
    emb = jnp.where(valid, scale * x + t, 0.0)                     # (D, TB)

    # ---- classifier: 2 hidden GELU layers + 1 logit, sigmoid ----
    # TODO(synk): torch nn.GELU defaults to exact erf GELU; tanh approximation used here.
    cw1 = w_ref[_OFF_CW1:_OFF_CW1 + _R_CW1, 0:D]                   # (C, D)
    cb1 = w_ref[_OFF_CW1:_OFF_CW1 + _R_CW1, BC:BC + 1]             # (C, 1)
    h1 = jax.nn.gelu(
        jnp.dot(cw1, emb, preferred_element_type=jnp.float32) + cb1,
        approximate=True,
    )                                                              # (C, TB)

    cw2 = w_ref[_OFF_CW2:_OFF_CW2 + _R_CW2, 0:C]                   # (C, C)
    cb2 = w_ref[_OFF_CW2:_OFF_CW2 + _R_CW2, BC:BC + 1]             # (C, 1)
    h2 = jax.nn.gelu(
        jnp.dot(cw2, h1, preferred_element_type=jnp.float32) + cb2,
        approximate=True,
    )                                                              # (C, TB)

    cw3 = w_ref[_OFF_CW3:_OFF_CW3 + _R_CW3, 0:C]                   # (1, C)
    cb3 = w_ref[_OFF_CW3:_OFF_CW3 + _R_CW3, BC:BC + 1]             # (1, 1)
    logit = jnp.dot(cw3, h2, preferred_element_type=jnp.float32) + cb3  # (1, TB)

    out_ref[...] = jax.nn.sigmoid(logit)                           # lane-dense store


# ---------------------------------------------------------------------------
# Parameter packing (transpose to W^T form, fuse flows, biases in last column)
# ---------------------------------------------------------------------------
def pack_params(params, D=DATA_DIM, H=FLOW_HIDDEN, C=CLF_HIDDEN):
    (f0_w1, f0_b1, f0_ws, f0_bs, f0_wt, f0_bt,
     f1_w1, f1_b1, f1_ws, f1_bs, f1_wt, f1_bt,
     c_w1, c_b1, c_w2, c_b2, c_w3, c_b3) = params

    # Fused first layer of both flows: (2H, D)
    w1f = jnp.concatenate([f0_w1.T, f1_w1.T], axis=0)
    b1f = jnp.concatenate([f0_b1.T, f1_b1.T], axis=0)              # (2H, 1)

    # Fused block-diagonal second layer: rows = [u0, t0, u1, t1], cols = [h0 | h1]
    zDH = jnp.zeros((D, H), jnp.float32)
    w2f = jnp.concatenate(
        [
            jnp.concatenate([f0_ws.T, zDH], axis=1),
            jnp.concatenate([f0_wt.T, zDH], axis=1),
            jnp.concatenate([zDH, f1_ws.T], axis=1),
            jnp.concatenate([zDH, f1_wt.T], axis=1),
        ],
        axis=0,
    )                                                              # (4D, 2H)
    b2f = jnp.concatenate([f0_bs.T, f0_bt.T, f1_bs.T, f1_bt.T], axis=0)  # (4D, 1)

    cw1, cb1 = c_w1.T, c_b1.T                                      # (C, D), (C, 1)
    cw2, cb2 = c_w2.T, c_b2.T                                      # (C, C), (C, 1)
    cw3, cb3 = c_w3.T, c_b3.reshape(1, 1)                          # (1, C), (1, 1)

    def pack(w, b):
        w = jnp.pad(w, ((0, 0), (0, _BIAS_COL - w.shape[1])))      # -> (rows, 64)
        return jnp.concatenate([w, b], axis=1)                     # -> (rows, 65)

    w_slab = jnp.concatenate(
        [pack(w1f, b1f), pack(w2f, b2f), pack(cw1, cb1),
         pack(cw2, cb2), pack(cw3, cb3)],
        axis=0,
    ).astype(jnp.float32)                                          # (161, 65)

    assert w_slab.shape == (_SLAB_ROWS, _SLAB_WIDTH)
    return w_slab


# ---------------------------------------------------------------------------
# Batch-tile heuristic
# ---------------------------------------------------------------------------
def _pick_block_b(B):
    if B % 128 != 0:
        return B                        # single (unaligned) tile; grid of 1
    if B > 16384:
        # Largest 128-aligned divisor of B that is <= 16384 lanes (>= 2 steps).
        for cand in range(16384, 127, -128):
            if B % cand == 0:
                return cand
        return 128
    if B >= 8192 and (B // 2) % 128 == 0:
        # Dual-TensorCore parts (v7x): split into 2 parallel steps once each
        # step still gets >= 4096 lanes so the ~0.35us/step overhead stays <10%.
        return B // 2
    return B                            # single-TC optimum: whole batch, grid of 1


# ---------------------------------------------------------------------------
# Wrapper
# ---------------------------------------------------------------------------
def binary_fair_forward(data, context, w_slab, *, block_b=None):
    B, D = data.shape
    assert D == DATA_DIM

    if block_b is None:
        block_b = _pick_block_b(B)
    assert B % block_b == 0
    assert block_b == B or block_b % 128 == 0

    # Lane-dense layout: features on sublanes, batch on lanes.
    data_t = data.T.astype(jnp.float32)                            # (D, B)
    ctx_row = context.reshape(1, B).astype(jnp.float32)            # (1, B)

    out_t = pl.pallas_call(
        _binary_fair_kernel,
        out_shape=jax.ShapeDtypeStruct((1, B), jnp.float32),
        grid=(B // block_b,),
        in_specs=[
            pl.BlockSpec((D, block_b), lambda i: (0, i)),
            pl.BlockSpec((1, block_b), lambda i: (0, i)),
            pl.BlockSpec(w_slab.shape, lambda i: (0, 0)),
        ],
        out_specs=pl.BlockSpec((1, block_b), lambda i: (0, i)),
        compiler_params=pltpu.CompilerParams(
            dimension_semantics=("parallel",),
            vmem_limit_bytes=48 * 1024 * 1024,
            # Let XLA fuse the wrapper-side transpose / dtype cast into the
            # kernel's input DMA instead of a standalone HBM pass.
            allow_input_fusion=[True, True, False],
        ),
    )(data_t, ctx_row, w_slab)

    return out_t.T                                                 # (B, 1)


# ---------------------------------------------------------------------------
# Deterministic parameter initialization (synthetic; shapes follow __init__)
# ---------------------------------------------------------------------------
def init_params(key, D=DATA_DIM, H=FLOW_HIDDEN, C=CLF_HIDDEN):
    ks = jax.random.split(key, 9)

    # MADE autoregressive masks (nflows-style degree assignment).
    in_deg = jnp.arange(1, D + 1)
    hid_deg = (jnp.arange(H) % (D - 1)) + 1
    out_deg = jnp.arange(1, D + 1)
    m_in = (hid_deg[None, :] >= in_deg[:, None]).astype(jnp.float32)   # (D, H)
    m_out = (out_deg[None, :] > hid_deg[:, None]).astype(jnp.float32)  # (H, D)

    def flow_params(k):
        k1, k2, k3 = jax.random.split(k, 3)
        w1 = jax.random.normal(k1, (D, H), jnp.float32) / jnp.sqrt(D) * m_in
        b1 = jnp.zeros((1, H), jnp.float32)
        ws = jax.random.normal(k2, (H, D), jnp.float32) / jnp.sqrt(H) * m_out
        bs = jnp.zeros((1, D), jnp.float32)
        wt = jax.random.normal(k3, (H, D), jnp.float32) / jnp.sqrt(H) * m_out
        bt = jnp.zeros((1, D), jnp.float32)
        return [w1, b1, ws, bs, wt, bt]

    flow0 = flow_params(ks[0])
    flow1 = flow_params(ks[1])

    c_w1 = jax.random.normal(ks[2], (D, C), jnp.float32) / jnp.sqrt(D)
    c_b1 = jax.random.normal(ks[3], (1, C), jnp.float32) * 0.01
    c_w2 = jax.random.normal(ks[4], (C, C), jnp.float32) / jnp.sqrt(C)
    c_b2 = jax.random.normal(ks[5], (1, C), jnp.float32) * 0.01
    c_w3 = jax.random.normal(ks[6], (C, 1), jnp.float32) / jnp.sqrt(C)
    c_b3 = jax.random.normal(ks[7], (1, 1), jnp.float32) * 0.01
    clf = [c_w1, c_b1, c_w2, c_b2, c_w3, c_b3]

    return flow0 + flow1 + clf


# ---------------------------------------------------------------------------
# Pure-JAX reference (mirrors the original module math; no Pallas)
# ---------------------------------------------------------------------------
def reference_forward(data, context, params):
    (f0_w1, f0_b1, f0_ws, f0_bs, f0_wt, f0_bt,
     f1_w1, f1_b1, f1_ws, f1_bs, f1_wt, f1_bt,
     c_w1, c_b1, c_w2, c_b2, c_w3, c_b3) = params

    def made(x, w1, b1, ws, bs, wt, bt):
        h = jnp.maximum(x @ w1 + b1, 0.0)
        u = h @ ws + bs
        t = h @ wt + bt
        scale = jax.nn.sigmoid(u + 2.0) + 1e-3
        return scale * x + t

    z0 = made(data, f0_w1, f0_b1, f0_ws, f0_bs, f0_wt, f0_bt)
    z1 = made(data, f1_w1, f1_b1, f1_ws, f1_bs, f1_wt, f1_bt)
    emb = z0 * (context == 0) + z1 * (context == 1)
    h = jax.nn.gelu(emb @ c_w1 + c_b1, approximate=True)
    h = jax.nn.gelu(h @ c_w2 + c_b2, approximate=True)
    return jax.nn.sigmoid(h @ c_w3 + c_b3)


# ---------------------------------------------------------------------------
if __name__ == "__main__":
    key = jax.random.PRNGKey(0)
    k_data, k_ctx, k_params = jax.random.split(key, 3)

    B = 256   # small, lane-aligned batch (single tile -> grid of 1)
    data = jax.random.normal(k_data, (B, DATA_DIM), jnp.float32)
    context = jax.random.bernoulli(k_ctx, 0.5, (B, 1)).astype(jnp.int32)

    params = init_params(k_params)
    w_slab = pack_params(params)

    forward = jax.jit(binary_fair_forward)
    out = forward(data, context, w_slab)
    out = jax.block_until_ready(out)

    ref = reference_forward(data, context, params)
    assert out.shape == (B, 1)
    assert jnp.allclose(out, ref, atol=1e-4, rtol=1e-4), "mismatch vs reference"

    print("KERNEL_OK")
</pallas_src>

<mosaic_0001>
module attributes {stable_mosaic.version = 11 : i64} {
  func.func @_binary_fair_kernel(%arg0: i32, %arg1: memref<8x256xf32, #tpu.memory_space<vmem>>, %arg2: memref<1x256xf32, #tpu.memory_space<vmem>>, %arg3: memref<161x65xf32, #tpu.memory_space<vmem>>, %arg4: memref<1x256xf32, #tpu.memory_space<vmem>>) attributes {dimension_semantics = [#tpu.dimension_semantics<parallel>], iteration_bounds = array<i64: 1>, scalar_prefetch = 0 : i64, scratch_operands = 0 : i64, tpu.core_type = #tpu.core_type<tc>, window_params = [{transform_indices = @transform_0, window_bounds = array<i64: 8, 256>}, {transform_indices = @transform_1, window_bounds = array<i64: 1, 256>}, {pipeline_mode = #tpu.pipeline_mode<synchronous>, transform_indices = @transform_2, window_bounds = array<i64: 161, 65>}, {transform_indices = @transform_3, window_bounds = array<i64: 1, 256>}]} {
    %c0 = arith.constant 0 : index
    %c0_0 = arith.constant 0 : index
    %0 = vector.load %arg1[%c0, %c0_0] : memref<8x256xf32, #tpu.memory_space<vmem>>, vector<8x256xf32>
    %c0_1 = arith.constant 0 : index
    %c0_2 = arith.constant 0 : index
    %1 = vector.load %arg2[%c0_1, %c0_2] : memref<1x256xf32, #tpu.memory_space<vmem>>, vector<1x256xf32>
    %cst = arith.constant 0.000000e+00 : f32
    %2 = vector.broadcast %cst : f32 to vector<1x256xf32>
    %3 = arith.cmpf oeq, %1, %2 : vector<1x256xf32>
    %cst_3 = arith.constant 1.000000e+00 : f32
    %4 = vector.broadcast %cst_3 : f32 to vector<1x256xf32>
    %5 = arith.cmpf oeq, %1, %4 : vector<1x256xf32>
    %6 = arith.ori %3, %5 : vector<1x256xi1>
    %c0_4 = arith.constant 0 : index
    %c0_5 = arith.constant 0 : index
    %7 = vector.load %arg3[%c0_4, %c0_5] : memref<161x65xf32, #tpu.memory_space<vmem>>, vector<64x8xf32>
    %c0_6 = arith.constant 0 : index
    %c64 = arith.constant 64 : index
    %8 = vector.load %arg3[%c0_6, %c64] : memref<161x65xf32, #tpu.memory_space<vmem>>, vector<64x1xf32>
    %cst_7 = arith.constant dense<0.000000e+00> : vector<64x256xf32>
    %9 = tpu.matmul %7, %0, %cst_7 {dimension_numbers = #tpu.dot_dimension_numbers<[1], [0], [0], [1], [0, 0, 1, 1], [], []>} : vector<64x8xf32>, vector<8x256xf32>, vector<64x256xf32> -> vector<64x256xf32>
    %10 = vector.broadcast %8 : vector<64x1xf32> to vector<64x256xf32>
    %11 = arith.addf %9, %10 : vector<64x256xf32>
    %cst_8 = arith.constant 0.000000e+00 : f32
    %12 = vector.broadcast %cst_8 : f32 to vector<64x256xf32>
    %13 = arith.maximumf %11, %12 : vector<64x256xf32>
    %c64_9 = arith.constant 64 : index
    %c0_10 = arith.constant 0 : index
    %14 = vector.load %arg3[%c64_9, %c0_10] : memref<161x65xf32, #tpu.memory_space<vmem>>, vector<32x64xf32>
    %c64_11 = arith.constant 64 : index
    %c64_12 = arith.constant 64 : index
    %15 = vector.load %arg3[%c64_11, %c64_12] : memref<161x65xf32, #tpu.memory_space<vmem>>, vector<32x1xf32>
    %cst_13 = arith.constant dense<0.000000e+00> : vector<32x256xf32>
    %16 = tpu.matmul %14, %13, %cst_13 {dimension_numbers = #tpu.dot_dimension_numbers<[1], [0], [0], [1], [0, 0, 1, 1], [], []>} : vector<32x64xf32>, vector<64x256xf32>, vector<32x256xf32> -> vector<32x256xf32>
    %17 = vector.broadcast %15 : vector<32x1xf32> to vector<32x256xf32>
    %18 = arith.addf %16, %17 : vector<32x256xf32>
    %19 = vector.extract_strided_slice %18 {offsets = [0, 0], sizes = [8, 256], strides = [1, 1]} : vector<32x256xf32> to vector<8x256xf32>
    %20 = vector.extract_strided_slice %18 {offsets = [8, 0], sizes = [8, 256], strides = [1, 1]} : vector<32x256xf32> to vector<8x256xf32>
    %21 = vector.extract_strided_slice %18 {offsets = [16, 0], sizes = [8, 256], strides = [1, 1]} : vector<32x256xf32> to vector<8x256xf32>
    %22 = vector.extract_strided_slice %18 {offsets = [24, 0], sizes = [8, 256], strides = [1, 1]} : vector<32x256xf32> to vector<8x256xf32>
    %23 = vector.shape_cast %3 : vector<1x256xi1> to vector<1x256xi1>
    %24 = vector.broadcast %23 : vector<1x256xi1> to vector<8x256xi1>
    %25 = arith.select %24, %19, %21 : vector<8x256xi1>, vector<8x256xf32>
    %26 = vector.shape_cast %3 : vector<1x256xi1> to vector<1x256xi1>
    %27 = vector.broadcast %26 : vector<1x256xi1> to vector<8x256xi1>
    %28 = arith.select %27, %20, %22 : vector<8x256xi1>, vector<8x256xf32>
    %cst_14 = arith.constant 2.000000e+00 : f32
    %29 = vector.broadcast %cst_14 : f32 to vector<8x256xf32>
    %30 = arith.addf %25, %29 : vector<8x256xf32>
    %31 = arith.negf %30 : vector<8x256xf32>
    %32 = math.exp %31 : vector<8x256xf32>
    %cst_15 = arith.constant 1.000000e+00 : f32
    %33 = vector.broadcast %cst_15 : f32 to vector<8x256xf32>
    %34 = arith.addf %33, %32 : vector<8x256xf32>
    %35 = arith.divf %33, %34 : vector<8x256xf32>
    %cst_16 = arith.constant 1.000000e-03 : f32
    %36 = vector.broadcast %cst_16 : f32 to vector<8x256xf32>
    %37 = arith.addf %35, %36 : vector<8x256xf32>
    %38 = arith.mulf %37, %0 : vector<8x256xf32>
    %39 = arith.addf %38, %28 : vector<8x256xf32>
    %cst_17 = arith.constant 0.000000e+00 : f32
    %40 = vector.shape_cast %6 : vector<1x256xi1> to vector<1x256xi1>
    %41 = vector.broadcast %40 : vector<1x256xi1> to vector<8x256xi1>
    %42 = vector.broadcast %cst_17 : f32 to vector<8x256xf32>
    %43 = arith.select %41, %39, %42 : vector<8x256xi1>, vector<8x256xf32>
    %c96 = arith.constant 96 : index
    %c0_18 = arith.constant 0 : index
    %44 = vector.load %arg3[%c96, %c0_18] : memref<161x65xf32, #tpu.memory_space<vmem>>, vector<32x8xf32>
    %c96_19 = arith.constant 96 : index
    %c64_20 = arith.constant 64 : index
    %45 = vector.load %arg3[%c96_19, %c64_20] : memref<161x65xf32, #tpu.memory_space<vmem>>, vector<32x1xf32>
    %cst_21 = arith.constant dense<0.000000e+00> : vector<32x256xf32>
    %46 = tpu.matmul %44, %43, %cst_21 {dimension_numbers = #tpu.dot_dimension_numbers<[1], [0], [0], [1], [0, 0, 1, 1], [], []>} : vector<32x8xf32>, vector<8x256xf32>, vector<32x256xf32> -> vector<32x256xf32>
    %47 = vector.broadcast %45 : vector<32x1xf32> to vector<32x256xf32>
    %48 = arith.addf %46, %47 : vector<32x256xf32>
    %49 = arith.mulf %48, %48 : vector<32x256xf32>
    %50 = arith.mulf %48, %49 : vector<32x256xf32>
    %cst_22 = arith.constant 4.471500e-02 : f32
    %51 = vector.broadcast %cst_22 : f32 to vector<32x256xf32>
    %52 = arith.mulf %51, %50 : vector<32x256xf32>
    %53 = arith.addf %48, %52 : vector<32x256xf32>
    %cst_23 = arith.constant 0.797884583 : f32
    %54 = vector.broadcast %cst_23 : f32 to vector<32x256xf32>
    %55 = arith.mulf %54, %53 : vector<32x256xf32>
    %56 = math.tanh %55 : vector<32x256xf32>
    %cst_24 = arith.constant 1.000000e+00 : f32
    %57 = vector.broadcast %cst_24 : f32 to vector<32x256xf32>
    %58 = arith.addf %57, %56 : vector<32x256xf32>
    %cst_25 = arith.constant 5.000000e-01 : f32
    %59 = vector.broadcast %cst_25 : f32 to vector<32x256xf32>
    %60 = arith.mulf %59, %58 : vector<32x256xf32>
    %61 = arith.mulf %48, %60 : vector<32x256xf32>
    %c128 = arith.constant 128 : index
    %c0_26 = arith.constant 0 : index
    %62 = vector.load %arg3[%c128, %c0_26] : memref<161x65xf32, #tpu.memory_space<vmem>>, vector<32x32xf32>
    %c128_27 = arith.constant 128 : index
    %c64_28 = arith.constant 64 : index
    %63 = vector.load %arg3[%c128_27, %c64_28] : memref<161x65xf32, #tpu.memory_space<vmem>>, vector<32x1xf32>
    %cst_29 = arith.constant dense<0.000000e+00> : vector<32x256xf32>
    %64 = tpu.matmul %62, %61, %cst_29 {dimension_numbers = #tpu.dot_dimension_numbers<[1], [0], [0], [1], [0, 0, 1, 1], [], []>} : vector<32x32xf32>, vector<32x256xf32>, vector<32x256xf32> -> vector<32x256xf32>
    %65 = vector.broadcast %63 : vector<32x1xf32> to vector<32x256xf32>
    %66 = arith.addf %64, %65 : vector<32x256xf32>
    %67 = arith.mulf %66, %66 : vector<32x256xf32>
    %68 = arith.mulf %66, %67 : vector<32x256xf32>
    %cst_30 = arith.constant 4.471500e-02 : f32
    %69 = vector.broadcast %cst_30 : f32 to vector<32x256xf32>
    %70 = arith.mulf %69, %68 : vector<32x256xf32>
    %71 = arith.addf %66, %70 : vector<32x256xf32>
    %cst_31 = arith.constant 0.797884583 : f32
    %72 = vector.broadcast %cst_31 : f32 to vector<32x256xf32>
    %73 = arith.mulf %72, %71 : vector<32x256xf32>
    %74 = math.tanh %73 : vector<32x256xf32>
    %cst_32 = arith.constant 1.000000e+00 : f32
    %75 = vector.broadcast %cst_32 : f32 to vector<32x256xf32>
    %76 = arith.addf %75, %74 : vector<32x256xf32>
    %cst_33 = arith.constant 5.000000e-01 : f32
    %77 = vector.broadcast %cst_33 : f32 to vector<32x256xf32>
    %78 = arith.mulf %77, %76 : vector<32x256xf32>
    %79 = arith.mulf %66, %78 : vector<32x256xf32>
    %c160 = arith.constant 160 : index
    %c0_34 = arith.constant 0 : index
    %80 = vector.load %arg3[%c160, %c0_34] : memref<161x65xf32, #tpu.memory_space<vmem>>, vector<1x32xf32>
    %c160_35 = arith.constant 160 : index
    %c64_36 = arith.constant 64 : index
    %81 = vector.load %arg3[%c160_35, %c64_36] : memref<161x65xf32, #tpu.memory_space<vmem>>, vector<1x1xf32>
    %cst_37 = arith.constant dense<0.000000e+00> : vector<1x256xf32>
    %82 = tpu.matmul %80, %79, %cst_37 {dimension_numbers = #tpu.dot_dimension_numbers<[1], [0], [0], [1], [0, 0, 1, 1], [], []>} : vector<1x32xf32>, vector<32x256xf32>, vector<1x256xf32> -> vector<1x256xf32>
    %83 = vector.broadcast %81 : vector<1x1xf32> to vector<1x256xf32>
    %84 = arith.addf %82, %83 : vector<1x256xf32>
    %85 = arith.negf %84 : vector<1x256xf32>
    %86 = math.exp %85 : vector<1x256xf32>
    %cst_38 = arith.constant 1.000000e+00 : f32
    %87 = vector.broadcast %cst_38 : f32 to vector<1x256xf32>
    %88 = arith.addf %87, %86 : vector<1x256xf32>
    %89 = arith.divf %87, %88 : vector<1x256xf32>
    %c0_39 = arith.constant 0 : index
    %c0_40 = arith.constant 0 : index
    %90 = vector.load %arg4[%c0_39, %c0_40] : memref<1x256xf32, #tpu.memory_space<vmem>>, vector<1x256xf32>
    tpu.vector_store %arg4[%c0_39, %c0_40], %89 {strides = array<i32>} : memref<1x256xf32, #tpu.memory_space<vmem>>, vector<1x256xf32>,
    return
  }
  func.func @transform_0(%arg0: i32) -> (i32, i32) {
    %c0_i32 = arith.constant 0 : i32
    %c0_i32_0 = arith.constant 0 : i32
    return %c0_i32, %arg0 : i32, i32
  }
  func.func @transform_1(%arg0: i32) -> (i32, i32) {
    %c0_i32 = arith.constant 0 : i32
    %c0_i32_0 = arith.constant 0 : i32
    return %c0_i32, %arg0 : i32, i32
  }
  func.func @transform_2(%arg0: i32) -> (i32, i32) {
    %c0_i32 = arith.constant 0 : i32
    %c0_i32_0 = arith.constant 0 : i32
    %c0_i32_1 = arith.constant 0 : i32
    return %c0_i32, %c0_i32_0 : i32, i32
  }
  func.func @transform_3(%arg0: i32) -> (i32, i32) {
    %c0_i32 = arith.constant 0 : i32
    %c0_i32_0 = arith.constant 0 : i32
    return %c0_i32, %arg0 : i32, i32
  }
}

</mosaic_0001>

<bundles_post_ra>
// kernel: binary_fair_forward.2
= control target key start
LH: loop header
LB: loop body
LE: loop exit
PB: predicated region body
PF: predicated region fallthrough
CT: control target
= control target key end

     0   :  { %vm97_vm0 = vcmask 64512   ;;  %v933_v3 = vmov 64   ;;  %s1255_s0 = inlined_call_operand.vmem [shape: f32[161,65], index: 0, kind: input, shape index: {}]   ;;  %s1256_s1 = inlined_call_operand.vmem [shape: f32[256,8], index: 1, kind: input, shape index: {}]   ;;  %s1257_s2 = inlined_call_operand.vmem [shape: s32[256,1], index: 2, kind: input, shape index: {}]   ;;  %s1258_s3 = inlined_call_operand.hbm [shape: f32[1,256], index: 3, kind: output, shape index: {}]  }
   0x1   :  { %v959_v0 = vld [vmem:[%s1256_s1] sm:$0xff]  ;;  %v964_v1 = vld [vmem:[%s1256_s1 + $0x8] sm:$0xff]  ;;  %857 = vset.pattern.permute.xlu1 %v933_v3  ;;  %v56_v5 = vld [vmem:[%s1255_s0 + $0x38] sm:$0xff] }
   0x2   :  { %v54_v2 = vld [vmem:[%s1255_s0 + $0x28] sm:$0xff]  ;;  %129 = vmatpush.msra.mxu0 %v959_v0  ;;  %v49_v4 = vld [vmem:[%s1255_s0] sm:$0xff]  ;;  %170 = vmatpush.msra.mxu1 %v964_v1 }
   0x3   :  { %84 = vperm.xlu1 %857, %v54_v2   ;;  %805 = vmatmul.msk.f32.vlgmr.msra.gmra.mxu0 %vm97_vm0, %v49_v4 }
   0x4   :  { %813 = vmatmul.msk.f32.vlgmr.msra.gmra.mxu1 %vm97_vm0, %v49_v4 }
   0x5   :  { %8 = vsyncpa [#allocation3], 0  ;;  %856 = vset.pattern.permute.xlu0 %v933_v3  ;;  %v52_v6 = vld [vmem:[%s1255_s0 + $0x18] sm:$0xff]  ;;  %858 = vset.pattern.permute.xlu2 %v933_v3  ;;  %v53_v7 = vld [vmem:[%s1255_s0 + $0x20] sm:$0xff]  ;;  %vm236_vm1 = vcmask 523264   ;;  %s794_s8 = sshll.u32 %s1258_s3, 4  ;;  %s795_s8 = int_to_ptr.hbm [resolvable:$true] %s794_s8 }
   0x6   :  { %94 = vperm.xlu0 %856, %v56_v5   ;;  %74 = vperm.xlu2 %858, %v52_v6   ;;  %v50_v8 = vld [vmem:[%s1255_s0 + $0x8] sm:$0xff]  ;;  %v55_v9 = vld [vmem:[%s1255_s0 + $0x30] sm:$0xff]  ;;  %v1014_v13 = vld [vmem:[%s1255_s0 + $0x40] sm:$0xff] }
   0x7   :  { %v51_v10 = vld [vmem:[%s1255_s0 + $0x10] sm:$0xff]  ;;  %v1001_v11 = vld [vmem:[%s1255_s0 + $0x48] sm:$0xff]  ;;  %v1026_v15 = vld [vmem:[%s1255_s0 + $0x58] sm:$0xff] }
   0x8   :  { %v1006_v12 = vld [vmem:[%s1255_s0 + $0x50] sm:$0xff]  ;;  %v1031_v16 = vld [vmem:[%s1255_s0 + $0x78] sm:$0xff]  ;;  %v1046_v18 = vld [vmem:[%s1255_s0 + $0x68] sm:$0xff] }
   0x9   :  { %v1021_v14 = vld [vmem:[%s1255_s0 + $0x70] sm:$0xff]  ;;  %v1041_v17 = vld [vmem:[%s1255_s0 + $0x98] sm:$0xff]  ;;  %v1051_v19 = vld [vmem:[%s1255_s0 + $0x60] sm:$0xff] }
   0xa   :  { %v1061_v20 = vld [vmem:[%s1255_s0 + $0x80] sm:$0xff]  ;;  %v1066_v21 = vld [vmem:[%s1255_s0 + $0x90] sm:$0xff]  ;;  %v1071_v22 = vld [vmem:[%s1255_s0 + $0x88] sm:$0xff] }
   0xb   :  { %79 = vperm.xlu1 %857, %v53_v7   ;;  %806 = vmatmul.msk.f32.gmra.mxu0 %vm97_vm0, %v50_v8  ;;  %v1081_v23 = vld [vmem:[%s1255_s0 + $0xa0] sm:$0x1] }
   0xc   :  { %814 = vmatmul.msk.f32.gmra.mxu1 %vm97_vm0, %v50_v8 }
   0xe   :  { %89 = vperm.xlu0 %856, %v55_v9   ;;  %69 = vperm.xlu2 %858, %v51_v10  }
  0x13   :  { %59 = vperm.xlu1 %857, %v49_v4   ;;  %807 = vmatmul.msk.f32.gmra.mxu0 %vm97_vm0, %v51_v10 }
  0x14   :  { %815 = vmatmul.msk.f32.gmra.mxu1 %vm97_vm0, %v51_v10 }
  0x16   :  { %64 = vperm.xlu0 %856, %v50_v8   ;;  %218 = vperm.xlu2 %858, %v1014_v13  }
  0x1b   :  { %223 = vperm.xlu1 %857, %v1001_v11   ;;  %808 = vmatmul.msk.f32.gmra.mxu0 %vm97_vm0, %v52_v6 }
  0x1c   :  { %816 = vmatmul.msk.f32.gmra.mxu1 %vm97_vm0, %v52_v6 }
  0x1e   :  { %228 = vperm.xlu0 %856, %v1006_v12   ;;  %233 = vperm.xlu2 %858, %v1026_v15  }
  0x23   :  { %381 = vperm.xlu1 %857, %v1021_v14   ;;  %809 = vmatmul.msk.f32.gmra.mxu0 %vm97_vm0, %v53_v7 }
  0x24   :  { %817 = vmatmul.msk.f32.gmra.mxu1 %vm97_vm0, %v53_v7 }
  0x26   :  { %386 = vperm.xlu0 %856, %v1031_v16   ;;  %376 = vperm.xlu2 %858, %v1046_v18  }
  0x2b   :  { %548 = vperm.xlu1 %857, %v1041_v17   ;;  %810 = vmatmul.msk.f32.gmra.mxu0 %vm97_vm0, %v54_v2 }
  0x2c   :  { %818 = vmatmul.msk.f32.gmra.mxu1 %vm97_vm0, %v54_v2 }
  0x2e   :  { %371 = vperm.xlu0 %856, %v1051_v19   ;;  %543 = vperm.xlu2 %858, %v1066_v21  }
  0x33   :  { %533 = vperm.xlu1 %857, %v1061_v20   ;;  %811 = vmatmul.msk.f32.gmra.mxu0 %vm97_vm0, %v55_v9 }
  0x34   :  { %819 = vmatmul.msk.f32.gmra.mxu1 %vm97_vm0, %v55_v9 }
  0x36   :  { %538 = vperm.xlu0 %856, %v1071_v22   ;;  %693 = vperm.xlu2 %858, %v1081_v23  }
  0x3b   :  { %812 = vmatmul.msk.f32.gmra.mxu0 %vm97_vm0, %v56_v5 }
  0x3c   :  { %820 = vmatmul.msk.f32.gmra.mxu1 %vm97_vm0, %v56_v5 }
  0x60   :  { %v75_v40 = vpop.permute.xlu2 %74 }
  0x68   :  { %v70_v57 = vpop.permute.xlu2 %69 }
  0x75   :  { %v85_v37 = vpop.permute.xlu1 %84 }
  0x78   :  { %v95_v36 = vpop.permute.xlu0 %94 }
  0x7d   :  { %v80_v42 = vpop.permute.xlu1 %79 }
  0x80   :  { %v131_v24 = vpop.f32.mrf.mxu0  ;;  %v90_v41 = vpop.permute.xlu0 %89 }
  0x81   :  { %v172_v25 = vpop.f32.mrf.mxu1 }
  0x85   :  { %v60_v5 = vpop.permute.xlu1 %59 }
  0x86   :  { %v132_v10 = vadd.f32 %v131_v24, %v60_v5  ;;  %v25_v24 = vld [vmem:[%s1257_s2] sm:$0x1] }
  0x88   :  { %v134_v26 = vpop.f32.mrf.mxu0  ;;  %v65_v62 = vpop.permute.xlu0 %64 }
  0x89   :  { %v175_v27 = vpop.f32.mrf.mxu1  ;;  %v135_v6 = vadd.f32 %v134_v26, %v65_v62 }
  0x8a   :  { %v176_v7 = vadd.f32 %v175_v27, %v65_v62 }
  0x90   :  { %v137_v28 = vpop.f32.mrf.mxu0 }
  0x91   :  { %v178_v29 = vpop.f32.mrf.mxu1  ;;  %v138_v63 = vadd.f32 %v137_v28, %v70_v57  ;;  %v199_v28 = vmax.f32 %v176_v7, 0.0 }
  0x92   :  { %v179_v2 = vadd.f32 %v178_v29, %v70_v57  ;;  %v196_v29 = vmax.f32 %v132_v10, 0.0 }
  0x98   :  { %v140_v30 = vpop.f32.mrf.mxu0 }
  0x99   :  { %v181_v31 = vpop.f32.mrf.mxu1  ;;  %v141_v58 = vadd.f32 %v140_v30, %v75_v40  ;;  %v173_v30 = vadd.f32 %v172_v25, %v60_v5  ;;  %v28_v25 = vcvt.s32.f32 %v25_v24 }
  0x9a   :  { %v182_v59 = vadd.f32 %v181_v31, %v75_v40  ;;  %v200_v31 = vmax.f32 %v138_v63, 0.0  ;;  %v219_v40 = vpop.permute.xlu2 %218 }
  0x9b   :  { %v202_v8 = vmax.f32 %v141_v58, 0.0  ;;  %32 = vst [vmem:[#allocation5] sm:$0x1] %v28_v25 }
  0x9c   :  { %v203_v9 = vmax.f32 %v182_v59, 0.0 }
  0xa0   :  { %v143_v32 = vpop.f32.mrf.mxu0 }
  0xa1   :  { %v184_v33 = vpop.f32.mrf.mxu1  ;;  %v144_v53 = vadd.f32 %v143_v32, %v80_v42  ;;  %v201_v32 = vmax.f32 %v179_v2, 0.0 }
  0xa2   :  { %v185_v54 = vadd.f32 %v184_v33, %v80_v42  ;;  %v198_v33 = vmax.f32 %v135_v6, 0.0 }
  0xa3   :  { %v204_v3 = vmax.f32 %v144_v53, 0.0 }
  0xa4   :  { %v205_v4 = vmax.f32 %v185_v54, 0.0 }
  0xa8   :  { %v146_v34 = vpop.f32.mrf.mxu0 }
  0xa9   :  { %v187_v35 = vpop.f32.mrf.mxu1  ;;  %v147_v49 = vadd.f32 %v146_v34, %v85_v37  ;;  %v197_v34 = vmax.f32 %v173_v30, 0.0 }
  0xaa   :  { %v188_v50 = vadd.f32 %v187_v35, %v85_v37 }
  0xab   :  { %v206_v60 = vmax.f32 %v147_v49, 0.0 }
  0xac   :  { %v207_v61 = vmax.f32 %v188_v50, 0.0 }
  0xb0   :  { %v149_v38 = vpop.f32.mrf.mxu0 }
  0xb1   :  { %v190_v39 = vpop.f32.mrf.mxu1  ;;  %v150_v45 = vadd.f32 %v149_v38, %v90_v41 }
  0xb2   :  { %v191_v46 = vadd.f32 %v190_v39, %v90_v41  ;;  %v229_v41 = vpop.permute.xlu0 %228 }
  0xb3   :  { %v208_v55 = vmax.f32 %v150_v45, 0.0 }
  0xb4   :  { %v209_v56 = vmax.f32 %v191_v46, 0.0 }
  0xb8   :  { %v152_v43 = vpop.f32.mrf.mxu0 }
  0xb9   :  { %v193_v44 = vpop.f32.mrf.mxu1  ;;  %v153_v47 = vadd.f32 %v152_v43, %v95_v36 }
  0xba   :  { %v194_v48 = vadd.f32 %v193_v44, %v95_v36 }
  0xbb   :  { %v210_v51 = vmax.f32 %v153_v47, 0.0 }
  0xbc   :  { %v211_v52 = vmax.f32 %v194_v48, 0.0 }
  0xbd   :  { %253 = vmatpush.msra.mxu2 %v210_v51 }
  0xbe   :  { %282 = vmatpush.msra.mxu3 %v211_v52 }
  0xbf   :  { %254 = vmatpush.msra.mxu2 %v208_v55 }
  0xc0   :  { %283 = vmatpush.msra.mxu3 %v209_v56 }
  0xc1   :  { %255 = vmatpush.msra.mxu2 %v206_v60 }
  0xc2   :  { %284 = vmatpush.msra.mxu3 %v207_v61 }
  0xc3   :  { %256 = vmatpush.msra.mxu2 %v204_v3 }
  0xc4   :  { %285 = vmatpush.msra.mxu3 %v205_v4 }
  0xc5   :  { %257 = vmatpush.msra.mxu2 %v202_v8 }
  0xc6   :  { %286 = vmatpush.msra.mxu3 %v203_v9 }
  0xc7   :  { %258 = vmatpush.msra.mxu2 %v200_v31 }
  0xc8   :  { %287 = vmatpush.msra.mxu3 %v201_v32 }
  0xc9   :  { %259 = vmatpush.msra.mxu2 %v198_v33 }
  0xca   :  { %288 = vmatpush.msra.mxu3 %v199_v28 }
  0xcb   :  { %260 = vmatpush.msra.mxu2 %v196_v29  ;;  %v234_v29 = vpop.permute.xlu2 %233 }
  0xcc   :  { %289 = vmatpush.msra.mxu3 %v197_v34  ;;  %821 = vmatmul.msk.f32.vlgmr.msra.gmra.mxu2 %vm236_vm1, %v1014_v13 }
  0xcd   :  { %825 = vmatmul.msk.f32.vlgmr.msra.gmra.mxu3 %vm236_vm1, %v1014_v13  ;;  %v804_v13 = vld [vmem:[%s1257_s2 + $0x1] sm:$0x1]  ;;  %s935_s2 = smov [#allocation2]  }
  0xce   :  { %v37_v26 = vcvt.s32.f32 %v804_v13  ;;  %s792_s5 = sshll.u32 %s935_s2, 4  ;;  %s793_s5 = int_to_ptr.vmem [resolvable:$true] %s792_s5 }
  0xd0   :  { %42 = vst [vmem:[#allocation5 + $0x1] sm:$0x1] %v37_v26 }
  0xd4   :  { %822 = vmatmul.msk.f32.gmra.mxu2 %vm236_vm1, %v1001_v11 }
  0xd5   :  { %826 = vmatmul.msk.f32.gmra.mxu3 %vm236_vm1, %v1001_v11 }
  0xd7   :  { %v45_v35 = vld [vmem:[#allocation5] sm:$0x3] }
  0xd8   :  { %vm46_vm2 = vcmp.eq.f32.partialorder %v45_v35, 0.0  ;;  %vm47_vm5 = vcmp.eq.f32.partialorder %v45_v35, 1.0 }
  0xd9   :  { %vm48_vm6 = vmor %vm46_vm2, %vm47_vm5 }
  0xdc   :  { %823 = vmatmul.msk.f32.gmra.mxu2 %vm236_vm1, %v1006_v12 }
  0xdd   :  { %827 = vmatmul.msk.f32.gmra.mxu3 %vm236_vm1, %v1006_v12 }
  0xe4   :  { %824 = vmatmul.msk.f32.gmra.mxu2 %vm236_vm1, %v1026_v15 }
  0xe5   :  { %828 = vmatmul.msk.f32.gmra.mxu3 %vm236_vm1, %v1026_v15  ;;  %v934_v15 = vmov 0  }
  0xe6   :  { %v303_v37 = vsel %vm46_vm2, 1, %v934_v15  ;;  %v358_v8 = vsel %vm48_vm6, 1, %v934_v15 }
  0xe7   :  { %v304_v38 = vperm.slane %v303_v37, 0  ;;  %v305_v39 = vperm.slane %v303_v37, 1  ;;  %v359_v24 = vperm.slane %v358_v8, 0 }
  0xe9   :  { %vm1105_vm3 = vcmp.eq.s32.totalorder %v304_v38, 1  ;;  %vm1109_vm4 = vcmp.eq.s32.totalorder %v305_v39, 1  ;;  %v360_v38 = vperm.slane %v358_v8, 1  ;;  %vm361_vm15 = vcmp.eq.s32.totalorder %v359_v24, 1 }
  0xeb   :  { %vm362_vm1 = vcmp.eq.s32.totalorder %v360_v38, 1 }
 0x14f   :  { %v262_v11 = vpop.f32.mrf.mxu2 }
 0x150   :  { %v291_v27 = vpop.f32.mrf.mxu3  ;;  %v263_v46 = vadd.f32 %v262_v11, %v219_v40 }
 0x151   :  { %v292_v47 = vadd.f32 %v291_v27, %v219_v40  ;;  %v224_v27 = vpop.permute.xlu1 %223 }
 0x157   :  { %v1100_v12 = vpop.f32.mrf.mxu2 }
 0x158   :  { %v1102_v36 = vpop.f32.mrf.mxu3  ;;  %v266_v39 = vadd.f32 %v1100_v12, %v224_v27 }
 0x15f   :  { %v268_v42 = vpop.f32.mrf.mxu2 }
 0x160   :  { %v297_v43 = vpop.f32.mrf.mxu3  ;;  %v269_v48 = vadd.f32 %v268_v42, %v229_v41 }
 0x161   :  { %v298_v49 = vadd.f32 %v297_v43, %v229_v41  ;;  %v295_v41 = vadd.f32 %v1102_v36, %v224_v27 }
 0x162   :  { %v308_v50 = vsel %vm1105_vm3, %v263_v46, %v269_v48 }
 0x163   :  { %v309_v51 = vsel %vm1109_vm4, %v292_v47, %v298_v49  ;;  %v312_v52 = vadd.f32 2.0, %v308_v50  ;;  %v377_v50 = vpop.permute.xlu2 %376 }
 0x164   :  { %v313_v53 = vadd.f32 2.0, %v309_v51 }
 0x165   :  { %v829_v54 = vmul.f32 -1.442695, %v312_v52 }
 0x166   :  { %v830_v55 = vmul.f32 -1.442695, %v313_v53 }
 0x167   :  { %859 = vpow2.f32 %v829_v54  ;;  %v271_v30 = vpop.f32.mrf.mxu2 }
 0x168   :  { %861 = vpow2.f32 %v830_v55  ;;  %v300_v32 = vpop.f32.mrf.mxu3  ;;  %v272_v25 = vadd.f32 %v271_v30, %v234_v29  ;;  %v382_v55 = vpop.permute.xlu1 %381 }
 0x169   :  { %v301_v35 = vadd.f32 %v300_v32, %v234_v29 }
 0x16a   :  { %v310_v43 = vsel %vm1105_vm3, %v266_v39, %v272_v25 }
 0x16b   :  { %v311_v48 = vsel %vm1109_vm4, %v295_v41, %v301_v35 }
 0x16d   :  { %v860_v56 = vpop.eup %859 }
 0x16e   :  { %v862_v57 = vpop.eup %861  ;;  %v320_v58 = vadd.f32 1.0, %v860_v56 }
 0x16f   :  { %v321_v59 = vadd.f32 1.0, %v862_v57 }
 0x170   :  { %863 = vrcp.f32 %v320_v58  ;;  %v333_v3 = vand.u32 2147483648, %v320_v58  ;;  %v331_v6 = vand.u32 2147483647, %v320_v58  ;;  %vm327_vm9 = vweird.f32 %v320_v58 }
 0x171   :  { %865 = vrcp.f32 %v321_v59  ;;  %v348_v7 = vand.u32 2147483648, %v321_v59  ;;  %v346_v10 = vand.u32 2147483647, %v321_v59  ;;  %vm342_vm11 = vweird.f32 %v321_v59 }
 0x172   :  { %v334_v33 = vor.u32 1.1754944e-38, %v333_v3  ;;  %vm332_vm12 = vcmp.eq.f32.partialorder %v331_v6, 8.507059e+37 }
 0x173   :  { %v349_v13 = vor.u32 1.1754944e-38, %v348_v7  ;;  %vm347_vm14 = vcmp.eq.f32.partialorder %v346_v10, 8.507059e+37 }
 0x176   :  { %v864_v60 = vpop.eup %863 }
 0x177   :  { %v866_v61 = vpop.eup %865  ;;  %v323_v62 = vmul.f32 %v864_v60, %v320_v58  ;;  %vm328_vm7 = vweird.f32 %v864_v60 }
 0x178   :  { %v338_v63 = vmul.f32 %v866_v61, %v321_v59  ;;  %vm343_vm8 = vweird.f32 %v866_v61  ;;  %vm329_vm10 = vmor %vm327_vm9, %vm328_vm7  ;;  %vm779_vm9 = vcmask 1040384  }
 0x179   :  { %v324_v2 = vsub.f32 1.0, %v323_v62  ;;  %vm344_vm13 = vmor %vm342_vm11, %vm343_vm8 }
 0x17a   :  { %v339_v4 = vsub.f32 1.0, %v338_v63 }
 0x17b   :  { %v325_v5 = vmul.f32 %v864_v60, %v324_v2 }
 0x17c   :  { %v340_v9 = vmul.f32 %v866_v61, %v339_v4 }
 0x17d   :  { %v326_v31 = vadd.f32 %v864_v60, %v325_v5 }
 0x17e   :  { %v341_v28 = vadd.f32 %v866_v61, %v340_v9 }
 0x17f   :  { %v330_v34 = vsel %vm329_vm10, %v864_v60, %v326_v31 }
 0x180   :  { %v335_v26 = vsel %vm332_vm12, %v334_v33, %v330_v34  ;;  %v345_v11 = vsel %vm344_vm13, %v866_v61, %v341_v28 }
 0x181   :  { %v352_v15 = vadd.f32 0.001, %v335_v26  ;;  %v350_v37 = vsel %vm347_vm14, %v349_v13, %v345_v11 }
 0x182   :  { %v353_v40 = vadd.f32 0.001, %v350_v37 }
 0x183   :  { %v354_v42 = vmul.f32 %v352_v15, %v959_v0  ;;  %v387_v0 = vpop.permute.xlu0 %386 }
 0x184   :  { %v355_v46 = vmul.f32 %v964_v1, %v353_v40 }
 0x185   :  { %v356_v47 = vadd.f32 %v354_v42, %v310_v43 }
 0x186   :  { %v357_v49 = vadd.f32 %v355_v46, %v311_v48 }
 0x187   :  { %831 = vmatpush.msk.msrb.mxu2 %vm361_vm15, %v356_v47 }
 0x188   :  { %836 = vmatpush.msk.msrb.mxu3 %vm362_vm1, %v357_v49  ;;  %832 = vmatmul.msk.f32.vlgmr.msrb.gmra.mxu2 %vm97_vm0, %v1051_v19 }
 0x189   :  { %837 = vmatmul.msk.f32.vlgmr.msrb.gmra.mxu3 %vm97_vm0, %v1051_v19 }
 0x18b   :  { %v372_v12 = vpop.permute.xlu0 %371 }
 0x190   :  { %833 = vmatmul.msk.f32.gmra.mxu2 %vm97_vm0, %v1046_v18 }
 0x191   :  { %838 = vmatmul.msk.f32.gmra.mxu3 %vm97_vm0, %v1046_v18 }
 0x198   :  { %834 = vmatmul.msk.f32.gmra.mxu2 %vm97_vm0, %v1021_v14 }
 0x199   :  { %839 = vmatmul.msk.f32.gmra.mxu3 %vm97_vm0, %v1021_v14 }
 0x1a0   :  { %835 = vmatmul.msk.f32.gmra.mxu2 %vm97_vm0, %v1031_v16 }
 0x1a1   :  { %840 = vmatmul.msk.f32.gmra.mxu3 %vm97_vm0, %v1031_v16  ;;  %vm551_vm0 = vcmask 261120  }
 0x20b   :  { %v414_v1 = vpop.f32.mrf.mxu2 }
 0x20c   :  { %v443_v19 = vpop.f32.mrf.mxu3  ;;  %v1142_v36 = vadd.f32 %v414_v1, %v372_v12 }
 0x20d   :  { %v1144_v44 = vadd.f32 %v443_v19, %v372_v12 }
 0x20e   :  { %v455_v14 = vmul.f32 %v1142_v36, %v1142_v36 }
 0x20f   :  { %v456_v52 = vmul.f32 %v1144_v44, %v1144_v44 }
 0x210   :  { %v463_v53 = vmul.f32 %v455_v14, %v1142_v36 }
 0x211   :  { %v464_v56 = vmul.f32 %v456_v52, %v1144_v44 }
 0x212   :  { %v471_v2 = vmul.f32 0.044715, %v463_v53 }
 0x213   :  { %v417_v18 = vpop.f32.mrf.mxu2  ;;  %v472_v5 = vmul.f32 0.044715, %v464_v56 }
 0x214   :  { %v446_v45 = vpop.f32.mrf.mxu3  ;;  %v1148_v51 = vadd.f32 %v417_v18, %v377_v50  ;;  %v479_v10 = vadd.f32 %v471_v2, %v1142_v36 }
 0x215   :  { %v1152_v16 = vadd.f32 %v446_v45, %v377_v50  ;;  %v480_v33 = vadd.f32 %v472_v5, %v1144_v44 }
 0x216   :  { %v457_v54 = vmul.f32 %v1148_v51, %v1148_v51  ;;  %v487_v11 = vmul.f32 0.7978846, %v479_v10 }
 0x217   :  { %v458_v57 = vmul.f32 %v1152_v16, %v1152_v16  ;;  %v488_v15 = vmul.f32 0.7978846, %v480_v33 }
 0x218   :  { %v465_v62 = vmul.f32 %v457_v54, %v1148_v51  ;;  %867 = vtanh.f32 %v487_v11  ;;  %v544_v11 = vpop.permute.xlu2 %543 }
 0x219   :  { %v466_v3 = vmul.f32 %v458_v57, %v1152_v16  ;;  %869 = vtanh.f32 %v488_v15 }
 0x21a   :  { %v473_v9 = vmul.f32 0.044715, %v465_v62 }
 0x21b   :  { %v420_v58 = vpop.f32.mrf.mxu2  ;;  %v474_v32 = vmul.f32 0.044715, %v466_v3 }
 0x21c   :  { %v1160_v59 = vadd.f32 %v420_v58, %v382_v55  ;;  %v449_v60 = vpop.f32.mrf.mxu3  ;;  %v481_v26 = vadd.f32 %v473_v9, %v1148_v51 }
 0x21d   :  { %v1162_v61 = vadd.f32 %v449_v60, %v382_v55  ;;  %v482_v35 = vadd.f32 %v474_v32, %v1152_v16 }
 0x21e   :  { %v459_v63 = vmul.f32 %v1160_v59, %v1160_v59  ;;  %v489_v42 = vmul.f32 0.7978846, %v481_v26  ;;  %v868_v1 = vpop.eup %867 }
 0x21f   :  { %v460_v4 = vmul.f32 %v1162_v61, %v1162_v61  ;;  %v490_v46 = vmul.f32 0.7978846, %v482_v35  ;;  %v870_v19 = vpop.eup %869 }
 0x220   :  { %v467_v6 = vmul.f32 %v459_v63, %v1160_v59  ;;  %v503_v63 = vadd.f32 1.0, %v868_v1 }
 0x221   :  { %v468_v7 = vmul.f32 %v460_v4, %v1162_v61  ;;  %v504_v4 = vadd.f32 1.0, %v870_v19 }
 0x222   :  { %v475_v8 = vmul.f32 0.044715, %v467_v6  ;;  %v511_v10 = vmul.f32 0.5, %v503_v63 }
 0x223   :  { %v423_v30 = vpop.f32.mrf.mxu2  ;;  %v476_v31 = vmul.f32 0.044715, %v468_v7 }
 0x224   :  { %v424_v28 = vadd.f32 %v423_v30, %v387_v0  ;;  %v452_v29 = vpop.f32.mrf.mxu3  ;;  %v483_v34 = vadd.f32 %v475_v8, %v1160_v59 }
 0x225   :  { %v453_v24 = vadd.f32 %v452_v29, %v387_v0  ;;  %v484_v13 = vadd.f32 %v476_v31, %v1162_v61  ;;  %v512_v31 = vmul.f32 0.5, %v504_v4 }
 0x226   :  { %v461_v25 = vmul.f32 %v424_v28, %v424_v28  ;;  %v491_v38 = vmul.f32 0.7978846, %v483_v34  ;;  %v539_v34 = vpop.permute.xlu0 %538 }
 0x227   :  { %v462_v27 = vmul.f32 %v453_v24, %v453_v24  ;;  %v492_v40 = vmul.f32 0.7978846, %v484_v13  ;;  %v520_v29 = vmul.f32 %v512_v31, %v1144_v44 }
 0x228   :  { %v469_v37 = vmul.f32 %v461_v25, %v424_v28  ;;  %871 = vtanh.f32 %v491_v38 }
 0x229   :  { %v470_v39 = vmul.f32 %v462_v27, %v453_v24  ;;  %873 = vtanh.f32 %v492_v40 }
 0x22a   :  { %v477_v41 = vmul.f32 0.044715, %v469_v37  ;;  %875 = vtanh.f32 %v489_v42 }
 0x22b   :  { %v478_v43 = vmul.f32 0.044715, %v470_v39  ;;  %877 = vtanh.f32 %v490_v46 }
 0x22c   :  { %v485_v47 = vadd.f32 %v477_v41, %v424_v28 }
 0x22d   :  { %v486_v48 = vadd.f32 %v478_v43, %v453_v24 }
 0x22e   :  { %v493_v49 = vmul.f32 0.7978846, %v485_v47  ;;  %v872_v12 = vpop.eup %871 }
 0x22f   :  { %v494_v0 = vmul.f32 0.7978846, %v486_v48  ;;  %v874_v18 = vpop.eup %873  ;;  %v507_v14 = vadd.f32 1.0, %v872_v12 }
 0x230   :  { %879 = vtanh.f32 %v493_v49  ;;  %v876_v45 = vpop.eup %875  ;;  %v508_v53 = vadd.f32 1.0, %v874_v18 }
 0x231   :  { %881 = vtanh.f32 %v494_v0  ;;  %v878_v50 = vpop.eup %877  ;;  %v505_v56 = vadd.f32 1.0, %v876_v45  ;;  %v515_v62 = vmul.f32 0.5, %v507_v14 }
 0x232   :  { %v506_v58 = vadd.f32 1.0, %v878_v50  ;;  %v516_v3 = vmul.f32 0.5, %v508_v53 }
 0x233   :  { %v513_v6 = vmul.f32 0.5, %v505_v56  ;;  %v523_v9 = vmul.f32 %v515_v62, %v1160_v59 }
 0x234   :  { %v514_v8 = vmul.f32 0.5, %v506_v58  ;;  %v524_v30 = vmul.f32 %v516_v3, %v1162_v61 }
 0x235   :  { %v521_v32 = vmul.f32 %v513_v6, %v1148_v51 }
 0x236   :  { %v880_v52 = vpop.eup %879  ;;  %v522_v33 = vmul.f32 %v514_v8, %v1152_v16 }
 0x237   :  { %v882_v54 = vpop.eup %881  ;;  %v509_v55 = vadd.f32 1.0, %v880_v52 }
 0x238   :  { %v510_v57 = vadd.f32 1.0, %v882_v54 }
 0x239   :  { %v517_v60 = vmul.f32 0.5, %v509_v55 }
 0x23a   :  { %v518_v2 = vmul.f32 0.5, %v510_v57 }
 0x23b   :  { %v525_v5 = vmul.f32 %v517_v60, %v424_v28  ;;  %v519_v28 = vmul.f32 %v511_v10, %v1142_v36  ;;  %v549_v36 = vpop.permute.xlu1 %548 }
 0x23c   :  { %v526_v7 = vmul.f32 %v518_v2, %v453_v24 }
 0x23d   :  { %572 = vmatpush.msrb.mxu0 %v525_v5 }
 0x23e   :  { %601 = vmatpush.msrb.mxu1 %v526_v7 }
 0x23f   :  { %573 = vmatpush.msrb.mxu0 %v523_v9 }
 0x240   :  { %602 = vmatpush.msrb.mxu1 %v524_v30 }
 0x241   :  { %574 = vmatpush.msrb.mxu0 %v521_v32 }
 0x242   :  { %603 = vmatpush.msrb.mxu1 %v522_v33 }
 0x243   :  { %575 = vmatpush.msrb.mxu0 %v519_v28  ;;  %v534_v51 = vpop.permute.xlu1 %533 }
 0x244   :  { %604 = vmatpush.msrb.mxu1 %v520_v29  ;;  %841 = vmatmul.msk.f32.vlgmr.msrb.gmra.mxu0 %vm551_vm0, %v1061_v20 }
 0x245   :  { %845 = vmatmul.msk.f32.vlgmr.msrb.gmra.mxu1 %vm551_vm0, %v1061_v20 }
 0x24c   :  { %842 = vmatmul.msk.f32.gmra.mxu0 %vm551_vm0, %v1071_v22 }
 0x24d   :  { %846 = vmatmul.msk.f32.gmra.mxu1 %vm551_vm0, %v1071_v22 }
 0x254   :  { %843 = vmatmul.msk.f32.gmra.mxu0 %vm551_vm0, %v1066_v21 }
 0x255   :  { %847 = vmatmul.msk.f32.gmra.mxu1 %vm551_vm0, %v1066_v21 }
 0x25c   :  { %844 = vmatmul.msk.f32.gmra.mxu0 %vm551_vm0, %v1041_v17 }
 0x25d   :  { %848 = vmatmul.msk.f32.gmra.mxu1 %vm551_vm0, %v1041_v17 }
 0x2c1   :  { %v577_v20 = vpop.f32.mrf.mxu0 }
 0x2c2   :  { %v606_v44 = vpop.f32.mrf.mxu1  ;;  %v1200_v16 = vadd.f32 %v577_v20, %v534_v51 }
 0x2c3   :  { %v1202_v59 = vadd.f32 %v606_v44, %v534_v51 }
 0x2c4   :  { %v618_v21 = vmul.f32 %v1200_v16, %v1200_v16 }
 0x2c5   :  { %v619_v13 = vmul.f32 %v1202_v59, %v1202_v59 }
 0x2c6   :  { %v626_v25 = vmul.f32 %v618_v21, %v1200_v16 }
 0x2c7   :  { %v627_v27 = vmul.f32 %v619_v13, %v1202_v59 }
 0x2c8   :  { %v634_v40 = vmul.f32 0.044715, %v626_v25 }
 0x2c9   :  { %v580_v22 = vpop.f32.mrf.mxu0  ;;  %v635_v43 = vmul.f32 0.044715, %v627_v27 }
 0x2ca   :  { %v609_v61 = vpop.f32.mrf.mxu1  ;;  %v1206_v24 = vadd.f32 %v580_v22, %v539_v34  ;;  %v642_v0 = vadd.f32 %v634_v40, %v1200_v16 }
 0x2cb   :  { %v1210_v17 = vadd.f32 %v609_v61, %v539_v34  ;;  %v643_v12 = vadd.f32 %v635_v43, %v1202_v59 }
 0x2cc   :  { %v620_v26 = vmul.f32 %v1206_v24, %v1206_v24  ;;  %v650_v58 = vmul.f32 0.7978846, %v642_v0 }
 0x2cd   :  { %v621_v35 = vmul.f32 %v1210_v17, %v1210_v17  ;;  %v651_v63 = vmul.f32 0.7978846, %v643_v12 }
 0x2ce   :  { %v628_v41 = vmul.f32 %v620_v26, %v1206_v24  ;;  %883 = vtanh.f32 %v650_v58 }
 0x2cf   :  { %v629_v46 = vmul.f32 %v621_v35, %v1210_v17  ;;  %885 = vtanh.f32 %v651_v63 }
 0x2d0   :  { %v636_v1 = vmul.f32 0.044715, %v628_v41 }
 0x2d1   :  { %v583_v15 = vpop.f32.mrf.mxu0  ;;  %v637_v18 = vmul.f32 0.044715, %v629_v46 }
 0x2d2   :  { %v1218_v37 = vadd.f32 %v583_v15, %v544_v11  ;;  %v612_v38 = vpop.f32.mrf.mxu1  ;;  %v644_v56 = vadd.f32 %v636_v1, %v1206_v24 }
 0x2d3   :  { %v1220_v39 = vadd.f32 %v612_v38, %v544_v11  ;;  %v645_v60 = vadd.f32 %v637_v18, %v1210_v17 }
 0x2d4   :  { %v622_v42 = vmul.f32 %v1218_v37, %v1218_v37  ;;  %v652_v7 = vmul.f32 0.7978846, %v644_v56  ;;  %v884_v33 = vpop.eup %883 }
 0x2d5   :  { %v623_v47 = vmul.f32 %v1220_v39, %v1220_v39  ;;  %v653_v9 = vmul.f32 0.7978846, %v645_v60  ;;  %v886_v28 = vpop.eup %885  ;;  %v666_v35 = vadd.f32 1.0, %v884_v33 }
 0x2d6   :  { %v630_v48 = vmul.f32 %v622_v42, %v1218_v37  ;;  %v667_v40 = vadd.f32 1.0, %v886_v28 }
 0x2d7   :  { %v631_v49 = vmul.f32 %v623_v47, %v1220_v39 }
 0x2d8   :  { %v638_v19 = vmul.f32 0.044715, %v630_v48  ;;  %v674_v48 = vmul.f32 0.5, %v666_v35  ;;  %v675_v0 = vmul.f32 0.5, %v667_v40 }
 0x2d9   :  { %v639_v45 = vmul.f32 0.044715, %v631_v49  ;;  %v586_v50 = vpop.f32.mrf.mxu0 }
 0x2da   :  { %v646_v14 = vadd.f32 %v638_v19, %v1218_v37  ;;  %v587_v52 = vadd.f32 %v586_v50, %v549_v36  ;;  %v615_v53 = vpop.f32.mrf.mxu1  ;;  %v682_v12 = vmul.f32 %v674_v48, %v1200_v16  ;;  %v683_v18 = vmul.f32 %v675_v0, %v1202_v59 }
 0x2db   :  { %v647_v54 = vadd.f32 %v639_v45, %v1220_v39  ;;  %v616_v55 = vadd.f32 %v615_v53, %v549_v36 }
 0x2dc   :  { %v624_v57 = vmul.f32 %v587_v52, %v587_v52  ;;  %v654_v3 = vmul.f32 0.7978846, %v646_v14 }
 0x2dd   :  { %v625_v62 = vmul.f32 %v616_v55, %v616_v55  ;;  %v655_v5 = vmul.f32 0.7978846, %v647_v54 }
 0x2de   :  { %v632_v2 = vmul.f32 %v624_v57, %v587_v52  ;;  %887 = vtanh.f32 %v654_v3 }
 0x2df   :  { %v633_v4 = vmul.f32 %v625_v62, %v616_v55  ;;  %889 = vtanh.f32 %v655_v5 }
 0x2e0   :  { %v640_v6 = vmul.f32 0.044715, %v632_v2  ;;  %891 = vtanh.f32 %v652_v7 }
 0x2e1   :  { %v641_v8 = vmul.f32 0.044715, %v633_v4  ;;  %893 = vtanh.f32 %v653_v9 }
 0x2e2   :  { %v648_v10 = vadd.f32 %v640_v6, %v587_v52 }
 0x2e3   :  { %v649_v30 = vadd.f32 %v641_v8, %v616_v55  ;;  %v782_v8 = vlaneseq }
 0x2e4   :  { %v656_v31 = vmul.f32 0.7978846, %v648_v10  ;;  %v888_v29 = vpop.eup %887 }
 0x2e5   :  { %v657_v32 = vmul.f32 0.7978846, %v649_v30  ;;  %v890_v36 = vpop.eup %889  ;;  %v670_v51 = vadd.f32 1.0, %v888_v29  ;;  %vm784_vm11 = vcmp.lt.s32.totalorder %v782_v8, 256 }
 0x2e6   :  { %895 = vtanh.f32 %v656_v31  ;;  %v892_v20 = vpop.eup %891  ;;  %v671_v61 = vadd.f32 1.0, %v890_v36 }
 0x2e7   :  { %897 = vtanh.f32 %v657_v32  ;;  %v894_v44 = vpop.eup %893  ;;  %v668_v13 = vadd.f32 1.0, %v892_v20  ;;  %v678_v27 = vmul.f32 0.5, %v670_v51 }
 0x2e8   :  { %v669_v26 = vadd.f32 1.0, %v894_v44  ;;  %v679_v38 = vmul.f32 0.5, %v671_v61 }
 0x2e9   :  { %v676_v42 = vmul.f32 0.5, %v668_v13  ;;  %v686_v47 = vmul.f32 %v678_v27, %v1218_v37  ;;  %v694_v37 = vpop.permute.xlu2 %693 }
 0x2ea   :  { %v677_v46 = vmul.f32 0.5, %v669_v26  ;;  %v687_v49 = vmul.f32 %v679_v38, %v1220_v39 }
 0x2eb   :  { %v684_v1 = vmul.f32 %v676_v42, %v1206_v24 }
 0x2ec   :  { %v896_v22 = vpop.eup %895  ;;  %v685_v19 = vmul.f32 %v677_v46, %v1210_v17 }
 0x2ed   :  { %v898_v34 = vpop.eup %897  ;;  %v672_v21 = vadd.f32 1.0, %v896_v22 }
 0x2ee   :  { %v673_v25 = vadd.f32 1.0, %v898_v34 }
 0x2ef   :  { %v680_v11 = vmul.f32 0.5, %v672_v21 }
 0x2f0   :  { %v681_v15 = vmul.f32 0.5, %v673_v25 }
 0x2f1   :  { %v688_v41 = vmul.f32 %v680_v11, %v587_v52 }
 0x2f2   :  { %v689_v43 = vmul.f32 %v681_v15, %v616_v55 }
 0x2f3   :  { %710 = vmatpush.msra.mxu2 %v688_v41 }
 0x2f4   :  { %730 = vmatpush.msra.mxu3 %v689_v43 }
 0x2f5   :  { %711 = vmatpush.msra.mxu2 %v686_v47 }
 0x2f6   :  { %731 = vmatpush.msra.mxu3 %v687_v49 }
 0x2f7   :  { %712 = vmatpush.msra.mxu2 %v684_v1 }
 0x2f8   :  { %732 = vmatpush.msra.mxu3 %v685_v19 }
 0x2f9   :  { %713 = vmatpush.msra.mxu2 %v682_v12 }
 0x2fa   :  { %733 = vmatpush.msra.mxu3 %v683_v18  ;;  %849 = vmatmul.msk.f32.vlgmr.msra.gmra.mxu2 %vm551_vm0, %v1081_v23 }
 0x2fb   :  { %850 = vmatmul.msk.f32.vlgmr.msra.gmra.mxu3 %vm551_vm0, %v1081_v23 }
 0x37d   :  { %v715_v39 = vpop.f32.mrf.mxu2 }
 0x37e   :  { %v716_v24 = vadd.f32 %v715_v39, %v694_v37  ;;  %v735_v45 = vpop.f32.mrf.mxu3 }
 0x37f   :  { %v736_v50 = vadd.f32 %v735_v45, %v694_v37 }
 0x380   :  { %v851_v17 = vmul.f32 -1.442695, %v716_v24 }
 0x381   :  { %v852_v14 = vmul.f32 -1.442695, %v736_v50 }
 0x382   :  { %899 = vpow2.f32 %v851_v17 }
 0x383   :  { %901 = vpow2.f32 %v852_v14 }
 0x388   :  { %v900_v16 = vpop.eup %899 }
 0x389   :  { %v902_v52 = vpop.eup %901  ;;  %v744_v59 = vadd.f32 1.0, %v900_v16 }
 0x38a   :  { %v745_v53 = vadd.f32 1.0, %v902_v52 }
 0x38b   :  { %903 = vrcp.f32 %v744_v59  ;;  %vm751_vm4 = vweird.f32 %v744_v59  ;;  %v757_v4 = vand.u32 2147483648, %v744_v59  ;;  %v755_v6 = vand.u32 2147483647, %v744_v59 }
 0x38c   :  { %905 = vrcp.f32 %v745_v53  ;;  %v772_v62 = vand.u32 2147483648, %v745_v53  ;;  %v770_v2 = vand.u32 2147483647, %v745_v53  ;;  %vm766_vm6 = vweird.f32 %v745_v53 }
 0x38d   :  { %v758_v31 = vor.u32 1.1754944e-38, %v757_v4  ;;  %vm756_vm10 = vcmp.eq.f32.partialorder %v755_v6, 8.507059e+37 }
 0x38e   :  { %v773_v9 = vor.u32 1.1754944e-38, %v772_v62  ;;  %vm771_vm8 = vcmp.eq.f32.partialorder %v770_v2, 8.507059e+37 }
 0x391   :  { %v904_v54 = vpop.eup %903 }
 0x392   :  { %v906_v55 = vpop.eup %905  ;;  %v747_v56 = vmul.f32 %v904_v54, %v744_v59  ;;  %vm752_vm2 = vweird.f32 %v904_v54 }
 0x393   :  { %v762_v57 = vmul.f32 %v906_v55, %v745_v53  ;;  %vm767_vm3 = vweird.f32 %v906_v55  ;;  %vm1246_vm5 = vmor %vm751_vm4, %vm752_vm2 }
 0x394   :  { %v748_v23 = vsub.f32 1.0, %v747_v56  ;;  %vm768_vm7 = vmor %vm766_vm6, %vm767_vm3 }
 0x395   :  { %v763_v58 = vsub.f32 1.0, %v762_v57 }
 0x396   :  { %v749_v60 = vmul.f32 %v904_v54, %v748_v23 }
 0x397   :  { %v764_v63 = vmul.f32 %v906_v55, %v763_v58 }
 0x398   :  { %v750_v3 = vadd.f32 %v904_v54, %v749_v60 }
 0x399   :  { %v765_v7 = vadd.f32 %v906_v55, %v764_v63 }
 0x39a   :  { %v754_v10 = vsel %vm1246_vm5, %v904_v54, %v750_v3 }
 0x39b   :  { %v769_v30 = vsel %vm768_vm7, %v906_v55, %v765_v7  ;;  %v759_v28 = vsel %vm756_vm10, %v758_v31, %v754_v10 }
 0x39c   :  { %v774_v32 = vsel %vm771_vm8, %v773_v9, %v769_v30 }
 0x39d   :  { %v778_v33 = vrot.slane %v774_v32, 7 }
 0x39f   :  { %v780_v29 = vsel %vm779_vm9, %v759_v28, %v778_v33 }
 0x3a0   :  { %786 = vst.msk [vmem:[#allocation2] sm:$0x3] %vm784_vm11, %v780_v29 }
 0x3a1   :  { %797 = dma.vmem_to_hbm [thread:$0]  %s793_s5, 32, %s795_s8, [#allocation3]  }
 0x3a2   :  { %931 = dma.done.wait [#allocation3], 32  }
 0x3a3   :  { %932 = vsyncadd [#allocation3], 4294967264 }
 0x3a4   :  { %802 = vsyncpa [#allocation3], 1 }

</bundles_post_ra>
